<compile_context>
chip_gen: v6e
topology: v6e:2x2x1
jax: 0.10.0
libtpu: 0.0.40
codegen_flags: <defaults>
</compile_context>

<pallas_src>
import functools

import jax
import jax.numpy as jnp
from jax.experimental import pallas as pl
from jax.experimental.pallas import tpu as pltpu


def _round_up(x: int, m: int) -> int:
    return (x + m - 1) // m * m


def _vmem_capacity_bytes() -> int:
    """Per-core VMEM capacity; conservative fallback if the query fails."""
    try:
        return int(pltpu.get_tpu_info().vmem_capacity_bytes)
    except Exception:
        return 64 << 20  # v7x physical VMEM per TensorCore (smallest of the fleet)


def _row_l1_kernel(feat_ref, out_ref, *, use_mxu: bool):
    """Per-row L1 norm of one feature tile.

    feat_ref: (tile_n, D) features in their HBM dtype
    out_ref : (tile_n, 1) float32 row L1 norms

    Rows in the out-of-bounds tail of the last tile may contain garbage; the
    wrapper only consumes rows < N, so no row-validity masking is needed here.
    """
    absf = jnp.abs(feat_ref[...])
    if use_mxu:
        # bf16 features: run the D-reduction on the MXU (exact: bf16 operands
        # enter the systolic array unmodified, accumulation is f32).
        ones = jnp.ones((absf.shape[1], 1), dtype=absf.dtype)
        row_l1 = jnp.dot(absf, ones, preferred_element_type=jnp.float32)
    else:
        row_l1 = jnp.sum(absf.astype(jnp.float32), axis=1, keepdims=True)
    out_ref[...] = row_l1


def _dic_loss_reference(features, labels):
    """Pure-XLA reference / small-problem fallback (same semantics)."""
    keep = labels == 0
    cnt = jnp.sum(keep.astype(jnp.float32))
    row_l1 = jnp.sum(jnp.abs(features).astype(jnp.float32), axis=1)
    total = jnp.sum(jnp.where(keep, row_l1, 0.0))
    return jnp.where(cnt > 0.0, total / jnp.maximum(cnt, 1.0), jnp.float32(0.0))


def dic_loss(features: jax.Array, labels: jax.Array, *,
             target_block_bytes: int | None = None,
             use_kernel: bool | None = None,
             min_kernel_bytes: int = 1 << 20) -> jax.Array:
    if features.ndim != 2:
        raise ValueError("features must be [N, D]")
    if features.shape[0] != labels.shape[0]:
        raise ValueError("Feature size and label size are different!!")

    n, d = features.shape
    if n == 0 or d == 0:
        return jnp.float32(0.0)

    itemsize = jnp.dtype(features.dtype).itemsize
    feat_bytes = n * d * itemsize

    # ---- per-chip VMEM budget -------------------------------------------------
    vmem_cap = _vmem_capacity_bytes()
    # Per-block budget (feature block + row-L1 output block).  16 MiB default
    # amortizes the ~0.35 us/step overhead on v7x's 3.2 TB/s HBM; clamp so the
    # double-buffered footprint always fits the chip with headroom.
    max_block = max((vmem_cap - (16 << 20)) // 3, 1 << 20)
    if target_block_bytes is None:
        target_block_bytes = 16 << 20
    target_block_bytes = int(min(target_block_bytes, max_block))

    # ---- per-row VMEM cost (lane dim pads to 128; (tile_n,1) f32 out block
    #      lane-pads to 128 as well -> 512 B/row) --------------------------------
    d_lanes = _round_up(d, 128)
    sublane_pack = max(8, 32 // max(itemsize, 1))      # f32: 8, bf16: 16, int8: 32
    feat_row_bytes = d_lanes * itemsize
    out_row_bytes = 128 * 4
    row_bytes = feat_row_bytes + out_row_bytes

    # Huge-D guard: even a minimal row tile would blow the block budget.
    kernel_ok = sublane_pack * row_bytes <= target_block_bytes

    if use_kernel is None:
        use_kernel = kernel_ok and feat_bytes >= min_kernel_bytes
    use_kernel = bool(use_kernel) and kernel_ok

    if not use_kernel:
        # Tiny inputs: pallas_call launch overhead cannot win; XLA fuses this.
        return _dic_loss_reference(features, labels)

    # ---- row tile: as large as the budget allows, capped to keep >= ~4 grid
    #      steps (>= 2 per TensorCore on v7x via the "parallel" axis) -----------
    tile_n = max(sublane_pack,
                 target_block_bytes // row_bytes // sublane_pack * sublane_pack)
    min_tiles = 4
    tile_cap = _round_up(-(-n // min_tiles), sublane_pack)
    tile_n = max(sublane_pack, min(tile_n, tile_cap))
    num_tiles = -(-n // tile_n)
    padded_rows = num_tiles * tile_n   # output is padded so its blocks never go OOB

    # ---- explicit VMEM limit derived from the real double-buffered footprint --
    vmem_needed = 2 * tile_n * row_bytes
    vmem_limit = int(min(max(vmem_needed + (4 << 20), 32 << 20),
                         max(vmem_cap - (8 << 20), vmem_needed + (2 << 20))))

    use_mxu = features.dtype == jnp.bfloat16
    kernel = functools.partial(_row_l1_kernel, use_mxu=use_mxu)

    row_l1 = pl.pallas_call(
        kernel,
        out_shape=jax.ShapeDtypeStruct((padded_rows, 1), jnp.float32),
        grid=(num_tiles,),
        in_specs=[pl.BlockSpec((tile_n, d), lambda i: (i, 0))],
        out_specs=pl.BlockSpec((tile_n, 1), lambda i: (i, 0)),
        compiler_params=pltpu.CompilerParams(
            dimension_semantics=("parallel",),
            vmem_limit_bytes=vmem_limit,
        ),
        cost_estimate=pl.CostEstimate(
            flops=2 * n * d,
            transcendentals=0,
            bytes_accessed=n * d * itemsize + padded_rows * 4,
        ),
    )(features)

    # ---- tiny fused epilogue: mask, count, mean, empty-selection guard --------
    keep = labels == 0
    count = jnp.sum(keep.astype(jnp.float32))
    # Select (not multiply): NaN/Inf-safe against rows excluded by the mask.
    total = jnp.sum(jnp.where(keep, row_l1[:n, 0], 0.0))
    return jnp.where(count > 0.0, total / jnp.maximum(count, 1.0), jnp.float32(0.0))


if __name__ == "__main__":
    key = jax.random.PRNGKey(0)
    k1, k2, k3, k4, k5 = jax.random.split(key, 5)

    # 1) Small-problem path (wrapper fallback; checks semantics + empty branch).
    N0, D0 = 16, 32
    f0 = jax.random.normal(k1, (N0, D0), dtype=jnp.float32)
    l0 = jax.random.randint(k2, (N0,), minval=0, maxval=2, dtype=jnp.int32)
    out0 = dic_loss(f0, l0)
    jax.block_until_ready(out0)
    assert jnp.allclose(out0, _dic_loss_reference(f0, l0), atol=1e-5, rtol=1e-5)
    out0e = dic_loss(f0, jnp.ones((N0,), jnp.int32))
    jax.block_until_ready(out0e)
    assert jnp.allclose(out0e, 0.0), out0e

    # 2) Pallas kernel path, f32: ragged N (OOB tail tile) + multi-tile grid.
    N1, D1 = 520, 96
    f1 = jax.random.normal(k3, (N1, D1), dtype=jnp.float32)
    l1 = jax.random.randint(k4, (N1,), minval=0, maxval=2, dtype=jnp.int32)
    out1 = dic_loss(f1, l1, target_block_bytes=64 * 1024, use_kernel=True)
    jax.block_until_ready(out1)
    ref1 = _dic_loss_reference(f1, l1)
    assert jnp.allclose(out1, ref1, atol=1e-4, rtol=1e-4), (out1, ref1)

    # Empty selection through the kernel path -> exactly 0.0.
    out1e = dic_loss(f1, jnp.ones((N1,), jnp.int32),
                     target_block_bytes=64 * 1024, use_kernel=True)
    jax.block_until_ready(out1e)
    assert jnp.allclose(out1e, 0.0), out1e

    # 3) Pallas kernel path, bf16 (MXU D-reduction), ragged N.
    N2, D2 = 300, 256
    f2 = jax.random.normal(k5, (N2, D2), dtype=jnp.float32).astype(jnp.bfloat16)
    l2 = jax.random.randint(k2, (N2,), minval=0, maxval=2, dtype=jnp.int32)
    out2 = dic_loss(f2, l2, target_block_bytes=128 * 1024, use_kernel=True)
    jax.block_until_ready(out2)
    ref2 = _dic_loss_reference(f2, l2)
    assert jnp.allclose(out2, ref2, atol=5e-2, rtol=5e-3), (out2, ref2)

    print("KERNEL_OK")
</pallas_src>

<mosaic_0001>
module attributes {stable_mosaic.version = 11 : i64} {
  func.func @_row_l1_kernel(%arg0: i32, %arg1: memref<64x96xf32, #tpu.memory_space<vmem>>, %arg2: memref<64x1xf32, #tpu.memory_space<vmem>>) attributes {dimension_semantics = [#tpu.dimension_semantics<parallel>], iteration_bounds = array<i64: 9>, scalar_prefetch = 0 : i64, scratch_operands = 0 : i64, tpu.core_type = #tpu.core_type<tc>, window_params = [{transform_indices = @transform_0, window_bounds = array<i64: 64, 96>}, {transform_indices = @transform_1, window_bounds = array<i64: 64, 1>}]} {
    %c0 = arith.constant 0 : index
    %c0_0 = arith.constant 0 : index
    %0 = vector.load %arg1[%c0, %c0_0] : memref<64x96xf32, #tpu.memory_space<vmem>>, vector<64x96xf32>
    %1 = math.absf %0 : vector<64x96xf32>
    %cst = arith.constant dense<0.000000e+00> : vector<64xf32>
    %2 = vector.multi_reduction <add>, %1, %cst [1] : vector<64x96xf32> to vector<64xf32>
    %3 = vector.shape_cast %2 : vector<64xf32> to vector<64x1xf32>
    %c0_1 = arith.constant 0 : index
    %c0_2 = arith.constant 0 : index
    %4 = vector.load %arg2[%c0_1, %c0_2] : memref<64x1xf32, #tpu.memory_space<vmem>>, vector<64x1xf32>
    tpu.vector_store %arg2[%c0_1, %c0_2], %3 {strides = array<i32>} : memref<64x1xf32, #tpu.memory_space<vmem>>, vector<64x1xf32>,
    return
  }
  func.func @transform_0(%arg0: i32) -> (i32, i32) {
    %c0_i32 = arith.constant 0 : i32
    %c0_i32_0 = arith.constant 0 : i32
    return %arg0, %c0_i32 : i32, i32
  }
  func.func @transform_1(%arg0: i32) -> (i32, i32) {
    %c0_i32 = arith.constant 0 : i32
    %c0_i32_0 = arith.constant 0 : i32
    return %arg0, %c0_i32 : i32, i32
  }
}

</mosaic_0001>

<bundles_post_ra>
// kernel: tpu_custom_call.1
= control target key start
LH: loop header
LB: loop body
LE: loop exit
PB: predicated region body
PF: predicated region fallthrough
CT: control target
= control target key end

     0   :  { %s283_s6 = smov 0   ;;  %s322_s0 = inlined_call_operand.vmem [shape: f32[520,96], index: 0, kind: input, shape index: {}]   ;;  %s323_s1 = inlined_call_operand.vmem [shape: f32[576,1], index: 1, kind: output, shape index: {}]  }
   0x1 LB: > { %s246_s7 = sadd.s32 4294967295, %s271_s6   ;;  %p250_p0 = scmp.ge.s32.totalorder %s271_s6, 1  ;;  %s271_s6 = sphi %s283_s6, %s11_s6  }
   0x2   : > { %p96_p1 = scmp.lt.s32.totalorder %s271_s6, 10 }
   0x4   : > { %p97_p2 = pnand %p250_p0, %p96_p1 }
   0x5   : > { %s291_s8 = sshll.u32 (!%p97_p2), %s246_s7, 3 }
   0x6   : > { %100 = sbr.rel (%p97_p2) target bundleno = 170 (0xaa), region = 24  ;;  %p125_p3 = scmp.lt.s32.totalorder (!%p97_p2), %s291_s8, 64 }
   0x7   : > { %p135_p4 = scmp.lt.s32.totalorder (!%p97_p2), %s291_s8, 71 }
   0xb   : > { %s126_s9 = scalar_select %p125_p3, %s291_s8, 64  ;;  %vm156_vm0 = vcmask 785408   ;;  %vm181_vm1 = vcmask 7168  }
   0xc   : > { %s325_s8 = smov (!%p135_p4, %s291_s8), 71 }
   0xd   : > { %s252_s10 = sshll.u32 %s126_s9, 3  ;;  %s254_s14 = sshll.u32 %s325_s8, 3 }
   0xe   : > { %s128_s13 = scalar_lea.vmem %s322_s0, %s252_s10  ;;  %s138_s17 = scalar_lea.vmem %s323_s1, %s254_s14 }
   0xf   : > { %v142_v0 = vld [vmem:[%s128_s13 + $0x10] sm:$0xff]  ;;  %v140_v1 = vld [vmem:[%s128_s13] sm:$0xff]  ;;  %v143_v2 = vld [vmem:[%s128_s13 + $0x18] sm:$0xff] }
  0x10   : > { %v150_v3 = vand.u32 2147483647, %v142_v0  ;;  %v148_v4 = vand.u32 2147483647, %v140_v1  ;;  %v151_v5 = vand.u32 2147483647, %v143_v2 }
  0x11   : > { %v141_v6 = vld [vmem:[%s128_s13 + $0x8] sm:$0xff]  ;;  %v144_v8 = vld [vmem:[%s128_s13 + $0x20] sm:$0xff]  ;;  %v147_v16 = vld [vmem:[%s128_s13 + $0x38] sm:$0xff] }
  0x12   : > { %v145_v7 = vld [vmem:[%s128_s13 + $0x28] sm:$0xff]  ;;  %v163_v9 = vsel %vm156_vm0, %v150_v3, 0.0  ;;  %v157_v10 = vsel %vm156_vm0, %v148_v4, 0.0  ;;  %v149_v11 = vand.u32 2147483647, %v141_v6  ;;  %v166_v12 = vsel %vm156_vm0, %v151_v5, 0.0 }
  0x13   : > { %164 = vadd.xlane.f32.xlu1 %v163_v9  ;;  %158 = vadd.xlane.f32.xlu0 %v157_v10  ;;  %v153_v14 = vand.u32 2147483647, %v145_v7  ;;  %v152_v15 = vand.u32 2147483647, %v144_v8  ;;  %v146_v17 = vld [vmem:[%s128_s13 + $0x30] sm:$0xff] }
  0x14   : > { %v160_v13 = vsel %vm156_vm0, %v149_v11, 0.0  ;;  %v155_v20 = vand.u32 2147483647, %v147_v16  ;;  %v154_v21 = vand.u32 2147483647, %v146_v17 }
  0x15   : > { %v172_v18 = vsel %vm156_vm0, %v153_v14, 0.0  ;;  %v169_v19 = vsel %vm156_vm0, %v152_v15, 0.0 }
  0x16   : > { %v178_v22 = vsel %vm156_vm0, %v155_v20, 0.0  ;;  %v175_v23 = vsel %vm156_vm0, %v154_v21, 0.0 }
  0x17   : > { %167 = vadd.xlane.f32.xlu1 %v166_v12  ;;  %161 = vadd.xlane.f32.xlu0 %v160_v13 }
  0x1b   : > { %173 = vadd.xlane.f32.xlu1 %v172_v18  ;;  %170 = vadd.xlane.f32.xlu0 %v169_v19 }
  0x1f   : > { %179 = vadd.xlane.f32.xlu1 %v178_v22  ;;  %176 = vadd.xlane.f32.xlu0 %v175_v23 }
  0x9c   : > { %v165_v24 = vpop.xlane.xlu1 %164  ;;  %v159_v25 = vpop.xlane.xlu0 %158 }
  0x9d   : > { %184 = vst.msk [vmem:[%s138_s17 + $0x10] sm:$0xff] %vm181_vm1, %v165_v24  ;;  %182 = vst.msk [vmem:[%s138_s17] sm:$0xff] %vm181_vm1, %v159_v25 }
  0xa0   : > { %v168_v26 = vpop.xlane.xlu1 %167  ;;  %v162_v27 = vpop.xlane.xlu0 %161 }
  0xa1   : > { %185 = vst.msk [vmem:[%s138_s17 + $0x18] sm:$0xff] %vm181_vm1, %v168_v26  ;;  %183 = vst.msk [vmem:[%s138_s17 + $0x8] sm:$0xff] %vm181_vm1, %v162_v27 }
  0xa4   : > { %v174_v28 = vpop.xlane.xlu1 %173  ;;  %v171_v29 = vpop.xlane.xlu0 %170 }
  0xa5   : > { %187 = vst.msk [vmem:[%s138_s17 + $0x28] sm:$0xff] %vm181_vm1, %v174_v28  ;;  %186 = vst.msk [vmem:[%s138_s17 + $0x20] sm:$0xff] %vm181_vm1, %v171_v29 }
  0xa8   : > { %v180_v30 = vpop.xlane.xlu1 %179  ;;  %v177_v31 = vpop.xlane.xlu0 %176 }
  0xa9   : > { %189 = vst.msk [vmem:[%s138_s17 + $0x38] sm:$0xff] %vm181_vm1, %v180_v30  ;;  %188 = vst.msk [vmem:[%s138_s17 + $0x30] sm:$0xff] %vm181_vm1, %v177_v31 }
  0xaa PF: > { %s11_s6 = sadd.s32 1, %s271_s6  }
  0xab   : > { %p8_p5 = scmp.ge.s32.totalorder %s11_s6, 11  }
  0xad   :  { %10 = sbr.rel (!%p8_p5) target bundleno = 1 (0x1), region = 54 }

</bundles_post_ra>
